<compile_context>
chip_gen: v7x
topology: tpu7x:2x2x1
jax: 0.10.0
libtpu: 0.0.40
codegen_flags: <defaults>
</compile_context>

<pallas_src>
import functools
import math

import jax
import jax.numpy as jnp
from jax import lax
from jax.experimental import pallas as pl
from jax.experimental.pallas import tpu as pltpu


def _round_up(x: int, m: int) -> int:
    return (x + m - 1) // m * m


def _round_down(x: int, m: int) -> int:
    return (x // m) * m


def _tpu_generation() -> str:
    try:
        kind = jax.devices()[0].device_kind.lower()
    except Exception:
        return "unknown"
    if "v7" in kind:
        return "v7x"
    if "v6" in kind:
        return "v6e"
    if "v5" in kind:
        return "v5e"
    return "unknown"


#                 tm_max, tn_pref, vmem_limit_bytes, split batch tiles across the 2 TCs
_GEN_CONFIG = {
    "v5e":     (1024, 128, 64 << 20, False),
    "v6e":     (1024, 256, 64 << 20, False),
    "v7x":     (512,  256, 48 << 20, True),
    "unknown": (512,  128, 48 << 20, True),   # conservative (fits v7x's 64 MiB VMEM)
}


def _decoder_kernel(x_ref, w_ref, b_ref, o_ref, *, compute_dtype):
    # x_ref: [tm, E]  native dtype (f32 from the embedder) -> cast in-register
    # w_ref: [tn, E]  compute dtype (PyTorch [L, E] layout; E is the lane-dense dim)
    # b_ref: [1,  tn] f32
    # o_ref: [tm, tn] f32  (tn is a multiple of 128 -> lane-dense, unmasked stores)
    x = x_ref[...].astype(compute_dtype)
    scores = lax.dot_general(
        x, w_ref[...],
        dimension_numbers=(((1,), (1,)), ((), ())),   # x @ w.T
        preferred_element_type=jnp.float32,
    )
    o_ref[...] = (scores + b_ref[...]).astype(o_ref.dtype)


def text_classifier_decoder(x, weight, bias, *,
                            compute_dtype=jnp.bfloat16,
                            tm=None, tn=None, use_pallas=None):
    """Pallas equivalent of `self.decoder(text_embedding_tensor)`.

    x:      [B, E] float32  (concatenated document embeddings; NOT copied/cast on host)
    weight: [L, E] float32  (PyTorch nn.Linear layout, kept untransposed)
    bias:   [L]    float32
    returns [B, L] float32 label scores
    """
    B, E = x.shape
    L, E_w = weight.shape
    assert E == E_w, "weight fan_in must match embedding length"
    assert bias.shape == (L,)

    if use_pallas is None:
        # Pallas fixed cost + wrapper ops dominate at tiny shapes; let XLA fuse it.
        use_pallas = (2 * B * E * L >= 1_000_000) or (B >= 512)
    if not use_pallas:
        return jnp.dot(x.astype(jnp.float32), weight.astype(jnp.float32).T,
                       preferred_element_type=jnp.float32) + bias

    gen = _tpu_generation()
    tm_max, tn_pref, vmem_limit, split_tc = _GEN_CONFIG[gen]

    # Lane-dense output: pad label dim to a multiple of 128 (weight/bias pads are tiny).
    L_pad = _round_up(L, 128)
    if tn is None:
        tn = tn_pref if (L_pad % tn_pref == 0) else 128
    assert tn % 128 == 0 and L_pad % tn == 0, "tn must be a multiple of 128 dividing L_pad"

    # Batch tile: multiple of 8 sublanes; on v7x keep >= 2 grid steps so both TCs work.
    if tm is None:
        tm_target = _round_up(B, 8)
        if split_tc and (L_pad // tn == 1) and B >= 16:
            tm_target = _round_up(pl.cdiv(B, 2), 8)
        tm = min(tm_max, tm_target)
    assert tm % 8 == 0 and tm >= 8, "tm must be a positive multiple of 8"

    # Keep double-buffered tiles inside the per-generation VMEM budget.
    budget = int(vmem_limit * 0.75)
    cd_item = jnp.dtype(compute_dtype).itemsize
    fixed = 2 * tn * E * cd_item + 2 * tn * 4                 # weight + bias buffers
    per_row = 2 * E * x.dtype.itemsize + 2 * tn * 4           # x + out buffers per row
    tm_fit = max(8, _round_down(max(8, (budget - fixed) // per_row), 8))
    tm = min(tm, tm_fit)

    # Small one-time pads/casts on weight & bias only (x is left untouched in HBM).
    w_p = weight if L_pad == L else jnp.pad(weight, ((0, L_pad - L), (0, 0)))
    w_p = w_p.astype(compute_dtype)
    b_p = bias if L_pad == L else jnp.pad(bias, (0, L_pad - L))
    b_p = b_p.reshape(1, L_pad).astype(jnp.float32)

    gi, gj = pl.cdiv(B, tm), L_pad // tn

    cost = pl.CostEstimate(
        flops=2 * B * E * L_pad,
        transcendentals=0,
        bytes_accessed=(B * E * x.dtype.itemsize          # x read once
                        + gi * L_pad * E * cd_item        # weight re-streamed per batch tile
                        + L_pad * 4                       # bias
                        + B * L_pad * 4),                 # f32 writeback
    )

    out = pl.pallas_call(
        functools.partial(_decoder_kernel, compute_dtype=compute_dtype),
        out_shape=jax.ShapeDtypeStruct((B, L_pad), jnp.float32),
        grid_spec=pl.GridSpec(
            # i outer, j inner: the large x tile stays resident while the small
            # weight tiles stream past it.
            grid=(gi, gj),
            in_specs=[
                pl.BlockSpec((tm, E), lambda i, j: (i, 0)),   # x tile (ragged last block ok)
                pl.BlockSpec((tn, E), lambda i, j: (j, 0)),   # weight tile ([L, E] layout)
                pl.BlockSpec((1, tn), lambda i, j: (0, j)),   # bias tile
            ],
            out_specs=pl.BlockSpec((tm, tn), lambda i, j: (i, j)),
        ),
        compiler_params=pltpu.CompilerParams(
            dimension_semantics=("parallel", "parallel"),
            vmem_limit_bytes=vmem_limit,
        ),
        cost_estimate=cost,
    )(x, w_p, b_p)

    return out[:, :L]


def init_decoder_params(key, embedding_length, num_labels):
    """Deterministic init matching TextClassifier._init_weights:
       - weight: xavier_uniform_  (gain=1)
       - bias:   PyTorch nn.Linear default: U(-1/sqrt(fan_in), 1/sqrt(fan_in))
    """
    kw, kb = jax.random.split(key)
    fan_in, fan_out = embedding_length, num_labels
    limit_w = math.sqrt(6.0 / (fan_in + fan_out))
    weight = jax.random.uniform(
        kw, (num_labels, embedding_length), jnp.float32, -limit_w, limit_w
    )
    limit_b = 1.0 / math.sqrt(fan_in)
    bias = jax.random.uniform(kb, (num_labels,), jnp.float32, -limit_b, limit_b)
    return weight, bias


if __name__ == "__main__":
    key = jax.random.PRNGKey(0)
    k_emb, k_params, k_tiny = jax.random.split(key, 3)

    # Small shapes consistent with the forward pass:
    #   batch of 64 sentences, document embedding length 256, 10 class labels.
    B, E, L = 64, 256, 10

    # "text_embedding_tensor" — stands in for the concatenated document embeddings.
    x = jax.random.normal(k_emb, (B, E), dtype=jnp.float32)
    weight, bias = init_decoder_params(k_params, E, L)

    # Pallas path (forced; the auto heuristic would route shapes this small to XLA).
    label_scores = text_classifier_decoder(x, weight, bias, use_pallas=True)
    jax.block_until_ready(label_scores)
    assert label_scores.shape == (B, L)

    # Reference with the same bf16-operand / f32-accumulate math (tight tolerance).
    ref_bf16 = (x.astype(jnp.bfloat16).astype(jnp.float32)
                @ weight.astype(jnp.bfloat16).astype(jnp.float32).T) + bias
    assert jnp.allclose(label_scores, ref_bf16, atol=2e-3, rtol=2e-3)

    # And close to the pure-f32 PyTorch semantics within bf16 input precision.
    ref_f32 = x @ weight.T + bias
    assert jnp.allclose(label_scores, ref_f32, atol=5e-2, rtol=5e-2)

    # Tiny-batch fast path (auto heuristic skips Pallas; its fixed cost would dominate).
    x_tiny = jax.random.normal(k_tiny, (4, E), dtype=jnp.float32)
    tiny_scores = text_classifier_decoder(x_tiny, weight, bias)
    jax.block_until_ready(tiny_scores)
    assert tiny_scores.shape == (4, L)
    assert jnp.allclose(tiny_scores, x_tiny @ weight.T + bias, atol=1e-4, rtol=1e-4)

    print("KERNEL_OK")
</pallas_src>

<mosaic_0001>
module attributes {stable_mosaic.version = 11 : i64} {
  func.func @_decoder_kernel(%arg0: i32, %arg1: i32, %arg2: memref<32x256xf32, #tpu.memory_space<vmem>>, %arg3: memref<128x256xbf16, #tpu.memory_space<vmem>>, %arg4: memref<1x128xf32, #tpu.memory_space<vmem>>, %arg5: memref<32x128xf32, #tpu.memory_space<vmem>>) attributes {dimension_semantics = [#tpu.dimension_semantics<parallel>, #tpu.dimension_semantics<parallel>], iteration_bounds = array<i64: 2, 1>, scalar_prefetch = 0 : i64, scratch_operands = 0 : i64, tpu.core_type = #tpu.core_type<tc>, window_params = [{transform_indices = @transform_0, window_bounds = array<i64: 32, 256>}, {transform_indices = @transform_1, window_bounds = array<i64: 128, 256>}, {transform_indices = @transform_2, window_bounds = array<i64: 1, 128>}, {transform_indices = @transform_3, window_bounds = array<i64: 32, 128>}]} {
    %c0 = arith.constant 0 : index
    %c0_0 = arith.constant 0 : index
    %0 = vector.load %arg2[%c0, %c0_0] : memref<32x256xf32, #tpu.memory_space<vmem>>, vector<32x256xf32>
    %1 = arith.truncf %0 : vector<32x256xf32> to vector<32x256xbf16>
    %c0_1 = arith.constant 0 : index
    %c0_2 = arith.constant 0 : index
    %2 = vector.load %arg3[%c0_1, %c0_2] : memref<128x256xbf16, #tpu.memory_space<vmem>>, vector<128x256xbf16>
    %cst = arith.constant dense<0.000000e+00> : vector<32x128xf32>
    %3 = tpu.matmul %1, %2, %cst {dimension_numbers = #tpu.dot_dimension_numbers<[1], [1], [0], [0], [0, 0, 1, 0], [], []>} : vector<32x256xbf16>, vector<128x256xbf16>, vector<32x128xf32> -> vector<32x128xf32>
    %c0_3 = arith.constant 0 : index
    %c0_4 = arith.constant 0 : index
    %4 = vector.load %arg4[%c0_3, %c0_4] : memref<1x128xf32, #tpu.memory_space<vmem>>, vector<1x128xf32>
    %5 = vector.broadcast %4 : vector<1x128xf32> to vector<32x128xf32>
    %6 = arith.addf %3, %5 : vector<32x128xf32>
    %c0_5 = arith.constant 0 : index
    %c0_6 = arith.constant 0 : index
    %7 = vector.load %arg5[%c0_5, %c0_6] : memref<32x128xf32, #tpu.memory_space<vmem>>, vector<32x128xf32>
    tpu.vector_store %arg5[%c0_5, %c0_6], %6 {strides = array<i32>} : memref<32x128xf32, #tpu.memory_space<vmem>>, vector<32x128xf32>,
    return
  }
  func.func @transform_0(%arg0: i32, %arg1: i32) -> (i32, i32) {
    %c0_i32 = arith.constant 0 : i32
    %c0_i32_0 = arith.constant 0 : i32
    return %arg0, %c0_i32 : i32, i32
  }
  func.func @transform_1(%arg0: i32, %arg1: i32) -> (i32, i32) {
    %c0_i32 = arith.constant 0 : i32
    %c0_i32_0 = arith.constant 0 : i32
    return %arg1, %c0_i32 : i32, i32
  }
  func.func @transform_2(%arg0: i32, %arg1: i32) -> (i32, i32) {
    %c0_i32 = arith.constant 0 : i32
    %c0_i32_0 = arith.constant 0 : i32
    return %c0_i32, %arg1 : i32, i32
  }
  func.func @transform_3(%arg0: i32, %arg1: i32) -> (i32, i32) {
    %c0_i32 = arith.constant 0 : i32
    return %arg0, %arg1 : i32, i32
  }
}

</mosaic_0001>

<bundles_post_ra>
// kernel: tpu_custom_call.1
= control target key start
LH: loop header
LB: loop body
LE: loop exit
PB: predicated region body
PF: predicated region fallthrough
CT: control target
= control target key end

     0   :  { %8 = vsyncpa [#allocation3], 0  ;;  %s1102_s0 = inlined_call_operand.hbm [shape: f32[64,256], index: 0, kind: input, shape index: {}]   ;;  %s1103_s1 = inlined_call_operand.hbm [shape: bf16[128,256], index: 1, kind: input, shape index: {}]   ;;  %s1104_s2 = inlined_call_operand.vmem [shape: f32[1,128], index: 2, kind: input, shape index: {}]   ;;  %s1105_s3 = inlined_call_operand.hbm [shape: f32[64,128], index: 3, kind: output, shape index: {}]  }
   0x1   :  { %10 = vsyncpa [#allocation3 + $0x1], 0 }
   0x2   :  { %11 = vsyncpa [#allocation6], 0 }
   0x3   :  { %12 = vsyncpa [#allocation4], 0 }
   0x4   :  { %14 = vsyncpa [#allocation4 + $0x1], 0  ;;  %s869_s12 = smov 0   ;;  %s871_s13 = smov 0  }
   0x5   :  { %s873_s14 = smov 0   ;;  %s875_s15 = smov 0  }
   0x6   :  { %s877_s16 = smov 0   ;;  %s879_s17 = smov 0  }
   0x7 LB: > { %s536_s18 = sadd.s32 4294967295, %s838_s17   ;;  %s537_s19 = sadd.s32 4294967294, %s838_s17   ;;  %s838_s17 = sphi %s879_s17, %s20_s17   ;;  %s834_s16 = sphi %s877_s16, %s1129_s16   ;;  %s830_s15 = sphi %s875_s15, %s1128_s15   ;;  %s826_s14 = sphi %s873_s14, %s1127_s14   ;;  %s822_s13 = sphi %s871_s13, %s1126_s13   ;;  %s818_s12 = sphi %s869_s12, %s1125_s12  }
   0x8   : > { %p52_p0 = scmp.ne.s32.totalorder %s822_s13, %s818_s12  ;;  %p903_p1 = scmp.eq.s32.totalorder %s536_s18, 0 }
   0x9   : > { %p907_p2 = scmp.eq.s32.totalorder %s536_s18, 1  ;;  %p136_p3 = scmp.eq.s32.totalorder %s537_s19, 1 }
   0xa   : > { %s1110_s20 = scalar_select %p903_p1, 1, 0 }
   0xb   : > { %s1111_s21 = scalar_select %p907_p2, 1, 0 }
   0xc   : > { %p913_p4 = por %p903_p1, %p52_p0  ;;  %p538_p5 = scmp.ge.s32.totalorder %s838_s17, 1 }
   0xd   : > { %p918_p6 = por %p136_p3, %p52_p0  ;;  %p143_p7 = scmp.lt.s32.totalorder %s838_s17, 3 }
   0xe   : > { %s1112_s22 = scalar_select %p913_p4, 1, 0 }
   0xf   : > { %s1113_s23 = scalar_select %p918_p6, 1, 0 }
  0x10   : > { %p923_p8 = pnand %p538_p5, %p143_p7  ;;  %s840_s25 = smov [#allocation5]  }
  0x11   : > { %s159_s26 = sshll.u32 %s840_s25, 4  ;;  %s32_s28 = sadd.s32 1, %s834_s16  ;;  %s160_s26 = int_to_ptr.vmem [resolvable:$true] %s159_s26 }
  0x12   : > { %s1114_s24 = scalar_select %p923_p8, 1, 0 }
  0x13   : > { %p599_p9 = pneg %p923_p8  ;;  %s694_s4 = scalar_lea.hbm %s1103_s1, 2048 }
  0x14   : > { %p695_p12 = scmp.ne.s32.totalorder %s1103_s1, %s694_s4  ;;  %p701_p5 = scmp.lt.u32.totalorder %s694_s4, %s1103_s1 }
  0x15   : > { %p932_p11 = pnand %p599_p9, %p903_p1 }
  0x17   : > { %p696_p13 = pneg %p932_p11 }
  0x19   : > { %p697_p0 = pnand %p696_p13, %p695_p12 }
  0x1b   : > { %p698_p3 = pneg %p697_p0 }
  0x1d   : > { %p703_p7 = pnand %p701_p5, %p698_p3 }
  0x1f   : > { %706 = shalt.err (!%p703_p7)
}
  0x20   : > { %s707_s9 = scalar_lea.vmem %s160_s26, 2048  ;;  %p715_p1 = scmp.lt.s32.totalorder %s160_s26, %s160_s26 }
  0x21   : > { %p708_p9 = scmp.ne.s32.totalorder %s160_s26, %s707_s9  ;;  %p716_p4 = scmp.lt.s32.totalorder %s707_s9, %s707_s9 }
  0x23   : > { %p710_p10 = pnand %p708_p9, %p696_p13  ;;  %p717_p8 = por %p716_p4, %p715_p1 }
  0x25   : > { %p711_p6 = pneg %p710_p10 }
  0x27   : > { %p718_p2 = pnand %p717_p8, %p711_p6 }
  0x29   : > { %721 = shalt.err (!%p718_p2)
}
  0x2a   : > { %s841_s10 = smov 128   ;;  %s842_s11 = smov 8  }
  0x2b   : > { %602 = dma.hbm_to_vmem [thread:$0]  (!%p932_p11), %s1103_s1, 2048, %s160_s26, [#allocation6], %s841_s10, %s841_s10, %s842_s11  }
  0x2c   : > { %p34_p1 = scmp.ge.s32.totalorder %s32_s28, 2  ;;  %s39_s25 = sadd.s32 1, %s826_s14 }
  0x2d   : > { %p46_p2 = scmp.ne.s32.totalorder %s826_s14, %s822_s13  ;;  %p47_p4 = scmp.eq.s32.totalorder %s838_s17, 0 }
  0x2e   : > { %s1131_s28 = smov (%p34_p1, %s32_s28), 0  ;;  %p1117_p8 = scmp.ne.s32.totalorder %s1111_s21, 0 }
  0x2f   : > { %p959_p6 = por %p47_p4, %p46_p2  ;;  %s36_s27 = ssub.s32 %s834_s16, %s1131_s28 }
  0x30   : > { %p965_p10 = por %p1117_p8, %p46_p2  ;;  %p612_p12 = scmp.lt.s32.totalorder %s838_s17, 2 }
  0x31   : > { %p37_p11 = scmp.eq.s32.totalorder %s36_s27, 0  ;;  %s179_s26 = sand.u32 1, %s826_s14  }
  0x32   : > { %s542_s4 = sshll.u32 %s179_s26, 6  ;;  %s573_s6 = sshll.u32 %s834_s16, 10 }
  0x33   : > { %s974_s5 = scalar_select %p37_p11, %s826_s14, %s39_s25  }
  0x34   : > { %s980_s9 = scalar_lea.hbm %s1102_s0, %s573_s6  ;;  %s183_s21 = scalar_lea.vmem [#allocation2], %s542_s4 }
  0x35   : > { %s191_s10 = sshll.u32 %s183_s21, 4  ;;  %p986_p13 = pnand %p612_p12, %p959_p6  ;;  %s982_s10 = int_to_ptr.vmem [resolvable:$true] %s191_s10 }
  0x36   : > { %s990_s18 = scalar_lea.sflag [#allocation3], %s179_s26  ;;  %s722_s19 = scalar_lea.hbm %s980_s9, 1024 }
  0x37   : > { %p723_p0 = scmp.ne.s32.totalorder %s980_s9, %s722_s19  ;;  %p724_p3 = pneg %p986_p13 }
  0x38   : > { %s727_s29 = scalar_lea.hbm %s1102_s0, 2048  ;;  %p728_p9 = scmp.lt.u32.totalorder %s980_s9, %s1102_s0 }
  0x39   : > { %p725_p5 = pnand %p724_p3, %p723_p0  ;;  %p729_p1 = scmp.lt.u32.totalorder %s727_s29, %s722_s19 }
  0x3a   : > { %p731_p4 = scmp.lt.u32.totalorder %s722_s19, %s980_s9 }
  0x3b   : > { %p726_p7 = pneg %p725_p5  ;;  %p730_p2 = por %p729_p1, %p728_p9 }
  0x3d   : > { %p732_p6 = por %p731_p4, %p730_p2 }
  0x3f   : > { %p733_p8 = pnand %p732_p6, %p726_p7 }
  0x41   : > { %736 = shalt.err (!%p733_p8)
}
  0x42   : > { %s737_s26 = scalar_lea.vmem %s982_s10, 1024  ;;  %s843_s7 = smov [#allocation2]  }
  0x43   : > { %p738_p12 = scmp.ne.s32.totalorder %s982_s10, %s737_s26  ;;  %s742_s8 = sshll.u32 %s843_s7, 4  ;;  %s743_s8 = int_to_ptr.vmem [resolvable:$false] %s742_s8 }
  0x44   : > { %s744_s21 = scalar_lea.vmem %s743_s8, 2048  ;;  %p745_p5 = scmp.lt.s32.totalorder %s982_s10, %s743_s8 }
  0x45   : > { %p740_p11 = pnand %p738_p12, %p724_p3  ;;  %p746_p9 = scmp.lt.s32.totalorder %s744_s21, %s737_s26 }
  0x47   : > { %p741_p0 = pneg %p740_p11  ;;  %p747_p1 = por %p746_p9, %p745_p5 }
  0x49   : > { %p748_p2 = pnand %p747_p1, %p741_p0 }
  0x4b   : > { %751 = shalt.err (!%p748_p2)
}
  0x4c   : > { %s844_s19 = smov 256   ;;  %s845_s25 = smov 16  }
  0x4d   : > { %606 = dma.hbm_to_vmem [thread:$0]  (!%p986_p13), %s980_s9, 1024, %s982_s10, %s990_s18, %s844_s19, %s844_s19, %s845_s25  }
  0x4e   : > { %p1120_p3 = scmp.ne.s32.totalorder %s1114_s24, 0 }
  0x4f   : > { %s1021_s27 = sand.u32 (!%p1120_p3), 1, %s822_s13   ;;  %p1121_p7 = scmp.ne.s32.totalorder (!%p1120_p3), %s1112_s22, 0 }
  0x50   : > { %203 = sbr.rel (%p1120_p3) target bundleno = 387 (0x183), region = 32  ;;  %s547_s29 = sshll.u32 (!%p1120_p3), %s1021_s27, 6 }
  0x51   : > { %s206_s4 = scalar_lea.sflag (!%p1120_p3), [#allocation3], %s1021_s27  ;;  %s1025_s6 = scalar_lea.vmem (!%p1120_p3), [#allocation2], %s547_s29 }
  0x57   : > { %805 = dma.done.wait (%p1121_p7), %s206_s4, 1024  }
  0x58   : > { %807 = vsyncadd (%p1121_p7), %s206_s4, 4294966272  ;;  %p1122_p13 = scmp.ne.s32.totalorder %s1110_s20, 0 }
  0x5a   : > { %809 = dma.done.wait (%p1122_p13), [#allocation6], 2048  }
  0x5b   : > { %811 = vsyncadd (%p1122_p13), [#allocation6], 4294965248  ;;  %v670_v0 = vld [vmem:[#allocation5 + $0x4] ss:$8 sps:$4 sm:$0xff]   ;;  %v672_v1 = vld [vmem:[#allocation5] ss:$8 sps:$4 sm:$0xff]  }
  0x5c   : > { %361 = vmatprep.subr.bf16.mxu0 %v670_v0  ;;  %575 = vmatprep.subr.bf16.mxu1 %v670_v0  ;;  %v673_v2 = vld [vmem:[#allocation5 + $0x14] ss:$8 sps:$4 sm:$0xff]   ;;  %v675_v3 = vld [vmem:[#allocation5 + $0x10] ss:$8 sps:$4 sm:$0xff]   ;;  %v676_v4 = vld [vmem:[#allocation5 + $0x24] ss:$8 sps:$4 sm:$0xff]  }
  0x5d   : > { %362 = vmatpush1.bf16.xpose.msra.mxu0 %v672_v1  ;;  %583 = vmatpush1.bf16.xpose.msra.mxu1 %v672_v1  ;;  %v247_v5 = vld [vmem:[%s1025_s6 + $0x8] sm:$0xff]  ;;  %v249_v6 = vld [vmem:[%s1025_s6 + $0x18] sm:$0xff]  ;;  %v246_v22 = vld [vmem:[%s1025_s6] sm:$0xff]  ;;  %s549_s20 = sshll.u32 %s1021_s27, 5  ;;  %s574_s11 = sshll.u32 %s830_s15, 9 }
  0x5e   : > { %363 = vmatprep.subr.bf16.mxu0 %v673_v2  ;;  %576 = vmatprep.subr.bf16.mxu1 %v673_v2  ;;  %v251_v7 = vld [vmem:[%s1025_s6 + $0x28] sm:$0xff]  ;;  %v253_v8 = vld [vmem:[%s1025_s6 + $0x38] sm:$0xff]  ;;  %v255_v9 = vpack.c.bf16 %v249_v6, %v247_v5  ;;  %v248_v23 = vld [vmem:[%s1025_s6 + $0x10] sm:$0xff]  ;;  %s238_s9 = scalar_lea.vmem [#allocation7], %s549_s20  ;;  %s1053_s7 = scalar_lea.hbm %s1105_s3, %s574_s11 }
  0x5f   : > { %v257_v10 = vpack.c.bf16 %v253_v8, %v251_v7  ;;  %v678_v11 = vld [vmem:[#allocation5 + $0x20] ss:$8 sps:$4 sm:$0xff]   ;;  %v679_v12 = vld [vmem:[#allocation5 + $0x34] ss:$8 sps:$4 sm:$0xff]   ;;  %v681_v13 = vld [vmem:[#allocation5 + $0x30] ss:$8 sps:$4 sm:$0xff]   ;;  %v254_v26 = vpack.c.bf16 %v248_v23, %v246_v22 }
  0x60   : > { %393 = vmatprep.mubr.bf16.mxu0 %v255_v9  ;;  %v682_v14 = vld [vmem:[#allocation5 + $0x44] ss:$8 sps:$4 sm:$0xff]   ;;  %v684_v15 = vld [vmem:[#allocation5 + $0x40] ss:$8 sps:$4 sm:$0xff]   ;;  %v685_v16 = vld [vmem:[#allocation5 + $0x54] ss:$8 sps:$4 sm:$0xff]  }
  0x61   : > { %401 = vmatprep.mubr.bf16.mxu1 %v257_v10  ;;  %v687_v17 = vld [vmem:[#allocation5 + $0x50] ss:$8 sps:$4 sm:$0xff]   ;;  %v688_v18 = vld [vmem:[#allocation5 + $0x64] ss:$8 sps:$4 sm:$0xff]   ;;  %v690_v19 = vld [vmem:[#allocation5 + $0x60] ss:$8 sps:$4 sm:$0xff]  }
  0x62   : > { %v691_v20 = vld [vmem:[#allocation5 + $0x74] ss:$8 sps:$4 sm:$0xff]   ;;  %v693_v21 = vld [vmem:[#allocation5 + $0x70] ss:$8 sps:$4 sm:$0xff]   ;;  %v250_v24 = vld [vmem:[%s1025_s6 + $0x20] sm:$0xff]  ;;  %s429_s10 = sshll.u32 %s238_s9, 4  ;;  %s1048_s10 = int_to_ptr.vmem [resolvable:$true] %s429_s10 }
  0x63   : > { %v252_v25 = vld [vmem:[%s1025_s6 + $0x30] sm:$0xff]  ;;  %v550_v28 = vld [vmem:[%s1104_s2] ss:$0 sm:$0xff]  ;;  %s415_s15 = scalar_lea.sflag [#allocation4], %s1021_s27  ;;  %s752_s8 = scalar_lea.vmem %s1048_s10, 512 }
  0x64   : > { %v256_v27 = vpack.c.bf16 %v252_v25, %v250_v24  ;;  %p753_p4 = scmp.ne.s32.totalorder %s1048_s10, %s752_s8  ;;  %s846_s21 = smov [#allocation7]  }
  0x65   : > { %364 = vmatpush1.bf16.xpose.msra.mxu0 %v675_v3  ;;  %584 = vmatpush1.bf16.xpose.msra.mxu1 %v675_v3  ;;  %s756_s19 = sshll.u32 %s846_s21, 4  ;;  %s757_s19 = int_to_ptr.vmem [resolvable:$false] %s756_s19 }
  0x66   : > { %365 = vmatprep.subr.bf16.mxu0 %v676_v4  ;;  %577 = vmatprep.subr.bf16.mxu1 %v676_v4  ;;  %p754_p6 = pnand %p753_p4, %p965_p10  ;;  %s758_s25 = scalar_lea.vmem %s757_s19, 1024 }
  0x67   : > { %p759_p12 = scmp.lt.s32.totalorder %s1048_s10, %s757_s19  ;;  %p760_p11 = scmp.lt.s32.totalorder %s758_s25, %s752_s8 }
  0x68   : > { %p755_p8 = pneg %p754_p6 }
  0x69   : > { %p761_p0 = por %p760_p11, %p759_p12 }
  0x6b   : > { %p762_p5 = pnand %p761_p0, %p755_p8 }
  0x6d   : > { %366 = vmatpush1.bf16.xpose.msra.mxu0 %v678_v11  ;;  %585 = vmatpush1.bf16.xpose.msra.mxu1 %v678_v11 }
  0x6e   : > { %367 = vmatprep.subr.bf16.mxu0 %v679_v12  ;;  %578 = vmatprep.subr.bf16.mxu1 %v679_v12 }
  0x75   : > { %368 = vmatpush1.bf16.xpose.msra.mxu0 %v681_v13  ;;  %586 = vmatpush1.bf16.xpose.msra.mxu1 %v681_v13 }
  0x76   : > { %369 = vmatprep.subr.bf16.mxu0 %v682_v14  ;;  %579 = vmatprep.subr.bf16.mxu1 %v682_v14 }
  0x7d   : > { %370 = vmatpush1.bf16.xpose.msra.mxu0 %v684_v15  ;;  %587 = vmatpush1.bf16.xpose.msra.mxu1 %v684_v15 }
  0x7e   : > { %371 = vmatprep.subr.bf16.mxu0 %v685_v16  ;;  %580 = vmatprep.subr.bf16.mxu1 %v685_v16 }
  0x85   : > { %372 = vmatpush1.bf16.xpose.msra.mxu0 %v687_v17  ;;  %588 = vmatpush1.bf16.xpose.msra.mxu1 %v687_v17 }
  0x86   : > { %373 = vmatprep.subr.bf16.mxu0 %v688_v18  ;;  %581 = vmatprep.subr.bf16.mxu1 %v688_v18 }
  0x8d   : > { %374 = vmatpush1.bf16.xpose.msra.mxu0 %v690_v19  ;;  %589 = vmatpush1.bf16.xpose.msra.mxu1 %v690_v19 }
  0x8e   : > { %375 = vmatprep.subr.bf16.mxu0 %v691_v20  ;;  %582 = vmatprep.subr.bf16.mxu1 %v691_v20 }
  0x95   : > { %376 = vmatpush1.bf16.xpose.msra.mxu0 %v693_v21  ;;  %590 = vmatpush1.bf16.xpose.msra.mxu1 %v693_v21 }
  0x9c   : > { %394 = vmatmul.mubr.bf16.vlgmr.msra.gmra.mrb[0].mxu0 %v254_v26  ;;  %402 = vmatmul.mubr.bf16.vlgmr.msra.gmra.mrb[0].mxu1 %v256_v27 }
 0x16f   : > { %v395_v29 = vpop.f32.mrb[0].mxu0  ;;  %v403_v30 = vpop.f32.mrb[0].mxu1 }
 0x170   : > { %v396_v31 = vadd.f32 %v550_v28, %v395_v29  ;;  %v404_v32 = vadd.f32 %v550_v28, %v403_v30  ;;  %v397_v33 = vpop.f32.mrb[1].mxu0  ;;  %v405_v34 = vpop.f32.mrb[1].mxu1 }
 0x171   : > { %v398_v35 = vpop.f32.mrb[2].mxu0  ;;  %v406_v36 = vpop.f32.mrb[2].mxu1 }
 0x172   : > { %410 = vst [vmem:[%s238_s9] sm:$0xff] %v396_v31  ;;  %412 = vst [vmem:[%s238_s9 + $0x10] sm:$0xff] %v404_v32  ;;  %v399_v37 = vadd.f32 %v550_v28, %v398_v35  ;;  %v407_v38 = vadd.f32 %v550_v28, %v406_v36  ;;  %v400_v39 = vpop.f32.mrb[3].mxu0  ;;  %v408_v40 = vpop.f32.mrb[3].mxu1 }
 0x174   : > { %411 = vst [vmem:[%s238_s9 + $0x8] sm:$0xff] %v399_v37  ;;  %413 = vst [vmem:[%s238_s9 + $0x18] sm:$0xff] %v407_v38 }
 0x175   : > { %765 = shalt.err (!%p762_p5)
}
 0x176   : > { %s766_s29 = scalar_lea.hbm %s1053_s7, 512  ;;  %s770_s20 = scalar_lea.hbm %s1105_s3, 1024 }
 0x177   : > { %p767_p9 = scmp.ne.s32.totalorder %s1053_s7, %s766_s29  ;;  %p771_p3 = scmp.lt.u32.totalorder %s1053_s7, %s1105_s3 }
 0x178   : > { %p772_p7 = scmp.lt.u32.totalorder %s770_s20, %s766_s29  ;;  %p774_p4 = scmp.lt.u32.totalorder %s766_s29, %s1053_s7 }
 0x179   : > { %p768_p1 = pnand %p767_p9, %p965_p10 }
 0x17a   : > { %p773_p13 = por %p772_p7, %p771_p3 }
 0x17b   : > { %p769_p2 = pneg %p768_p1 }
 0x17c   : > { %p775_p6 = por %p774_p4, %p773_p13 }
 0x17e   : > { %p776_p8 = pnand %p775_p6, %p769_p2 }
 0x180   : > { %779 = shalt.err (!%p776_p8)
}
 0x181   : > { %s847_s9 = smov 128   ;;  %s848_s11 = smov 8  }
 0x182   : > { %597 = dma.vmem_to_hbm [thread:$0]  (%p965_p10), %s1048_s10, 512, %s1053_s7, %s415_s15, %s847_s9, %s847_s9, %s848_s11  }
 0x183 PF: > { %s444_s18 = sand.u32 1, %s818_s12   ;;  %p1123_p12 = scmp.ne.s32.totalorder %s1113_s23, 0 }
 0x184   : > { %p1124_p11 = scmp.ge.s32.totalorder %s838_s17, 2  ;;  %s445_s26 = scalar_lea.sflag [#allocation4], %s444_s18 }
 0x186   : > { %p608_p0 = pnand %p1124_p11, %p1123_p12 }
 0x188   : > { %813 = dma.done.wait (!%p608_p0), %s445_s26, 512  }
 0x189   : > { %815 = vsyncadd (!%p608_p0), %s445_s26, 4294966784  ;;  %s20_s17 = sadd.s32 1, %s838_s17   ;;  %s1125_s12 = smov %s822_s13 }
 0x18a   : > { %p17_p5 = scmp.ge.s32.totalorder %s20_s17, 4   ;;  %s1126_s13 = smov %s826_s14 }
 0x18b   : > { %s1127_s14 = smov %s974_s5  ;;  %s1128_s15 = smov %s834_s16 }
 0x18c   : > { %s1129_s16 = smov %s1131_s28  ;;  %19 = sbr.rel (!%p17_p5) target bundleno = 7 (0x7), region = 85 }
 0x193   :  { %450 = vsyncpa [#allocation3], 1 }
 0x194   :  { %452 = vsyncpa [#allocation3 + $0x1], 1 }
 0x195   :  { %453 = vsyncpa [#allocation6], 1 }
 0x196   :  { %454 = vsyncpa [#allocation4], 1 }
 0x197   :  { %456 = vsyncpa [#allocation4 + $0x1], 1 }

</bundles_post_ra>
